<compile_context>
chip_gen: v6e
topology: v6e:2x2x1
jax: 0.10.0
libtpu: 0.0.40
codegen_flags: <defaults>
</compile_context>

<pallas_src>
import jax
import jax.numpy as jnp
from jax.experimental import pallas as pl
from jax.experimental.pallas import tpu as pltpu


def _round_up(x, m):
    return (x + m - 1) // m * m


def _make_actor_kernel(state_dim, d0, d1, action_dim, r1, r2):
    """Kernel over one batch tile. Single packed param slab resident in VMEM."""

    def kernel(x_ref, w_ref, o_ref):
        cdt = w_ref.dtype  # compute dtype for MXU operands (f32 or bf16)

        # x arrives in natural [TILE_B, state_dim] layout; cast (no-op for f32)
        # and put batch on the lane axis for the whole kernel.
        xt = x_ref[...].astype(cdt).T                      # (state_dim, TILE_B)

        # Static views into the packed parameter slab (weights [out, in],
        # bias as the extra column -> [out, 1] for lane-broadcast adds).
        w1 = w_ref[0:d0, 0:state_dim]
        b1 = w_ref[0:d0, state_dim:state_dim + 1]
        w2 = w_ref[r1:r1 + d1, 0:d0]
        b2 = w_ref[r1:r1 + d1, d0:d0 + 1]
        w3 = w_ref[r2:r2 + action_dim, 0:d1]
        b3 = w_ref[r2:r2 + action_dim, d1:d1 + 1]

        # Layer 1: h^T = W1 @ x^T  (MXU, f32 accumulate), bias + ReLU on VPU.
        h = jnp.dot(w1, xt, preferred_element_type=jnp.float32)
        h = jnp.maximum(h + b1.astype(jnp.float32), 0.0)
        # Layer 2.
        h = jnp.dot(w2, h.astype(cdt), preferred_element_type=jnp.float32)
        h = jnp.maximum(h + b2.astype(jnp.float32), 0.0)
        # Layer 3 + final tanh (EUP); elementwise math stays f32 (v5e-safe).
        h = jnp.dot(w3, h.astype(cdt), preferred_element_type=jnp.float32)
        o_ref[...] = jnp.tanh(h + b3.astype(jnp.float32)).astype(o_ref.dtype)

    return kernel


def pack_actor_params(params, compute_dtype=jnp.float32):
    """Pack ((w1,b1),(w2,b2),(w3,b3)) into a single [rows, C] slab + meta.

    Weights keep the torch layout [out_features, in_features]; each layer's
    bias occupies the extra column at lane index `in_features`.  Slabs are
    8-row aligned so in-kernel slices start on sublane-tile boundaries.
    """
    (w1, b1), (w2, b2), (w3, b3) = params
    d0, state_dim = w1.shape
    d1 = w2.shape[0]
    action_dim = w3.shape[0]

    C = max(state_dim, d0, d1) + 1          # +1 bias column
    r1 = _round_up(d0, 8)
    r2 = r1 + _round_up(d1, 8)
    rows = r2 + _round_up(action_dim, 8)

    w_packed = jnp.zeros((rows, C), compute_dtype)
    w_packed = w_packed.at[0:d0, 0:state_dim].set(w1.astype(compute_dtype))
    w_packed = w_packed.at[0:d0, state_dim].set(b1.astype(compute_dtype))
    w_packed = w_packed.at[r1:r1 + d1, 0:d0].set(w2.astype(compute_dtype))
    w_packed = w_packed.at[r1:r1 + d1, d0].set(b2.astype(compute_dtype))
    w_packed = w_packed.at[r2:r2 + action_dim, 0:d1].set(w3.astype(compute_dtype))
    w_packed = w_packed.at[r2:r2 + action_dim, d1].set(b3.astype(compute_dtype))

    meta = dict(state_dim=state_dim, d0=d0, d1=d1, action_dim=action_dim,
                r1=r1, r2=r2)
    return w_packed, meta


def _pick_tile_b(B):
    # Small batch: one exact tile (block == full array dims, no padding needed).
    if B <= 128:
        return B
    # Multi-tile: the output block's lane dim must be a multiple of 128.
    # Target >= 2 grid steps (v7x megacore) and cap at 1024 rows — per-step
    # overhead amortization dominates and VMEM footprint is < 1 MiB everywhere.
    half = -(-B // 2)
    return max(128, min(1024, _round_up(half, 128)))


def actor_td3_forward(state, w_packed, meta, *, tile_b=None):
    """state: [B, state_dim]. Returns tanh(MLP(state)) as [B, action_dim] f32."""
    B, state_dim = state.shape
    assert state_dim == meta["state_dim"]
    action_dim = meta["action_dim"]
    rows, C = w_packed.shape

    if tile_b is None:
        tile_b = _pick_tile_b(B)
    else:
        tile_b = min(tile_b, B)
        if tile_b < B:
            tile_b = max(128, _round_up(tile_b, 128))   # lane-aligned output blocks
            if tile_b >= B:
                tile_b = B

    grid = pl.cdiv(B, tile_b)   # ragged last tile handled by Pallas (no wrapper pad)

    kernel = _make_actor_kernel(meta["state_dim"], meta["d0"], meta["d1"],
                                meta["action_dim"], meta["r1"], meta["r2"])

    out_t = pl.pallas_call(
        kernel,
        out_shape=jax.ShapeDtypeStruct((action_dim, B), jnp.float32),
        grid_spec=pltpu.PrefetchScalarGridSpec(
            num_scalar_prefetch=0,
            grid=(grid,),
            in_specs=[
                # Batch-tiled activations in their natural HBM layout.
                pl.BlockSpec((tile_b, state_dim), lambda i: (i, 0)),
                # Single packed param slab: constant index -> DMA'd once,
                # VMEM-resident across all batch tiles.
                # (pipeline_mode=pl.Buffered(1) would make single-buffering
                #  explicit; left at default for maximum compatibility.)
                pl.BlockSpec((rows, C), lambda i: (0, 0)),
            ],
            out_specs=pl.BlockSpec((action_dim, tile_b), lambda i: (0, i)),
        ),
        compiler_params=pltpu.CompilerParams(
            # v7x: independent batch tiles shard across both TensorCores.
            dimension_semantics=("parallel",),
        ),
    )(state, w_packed)

    # Tiny [action_dim, B] -> [B, action_dim] transpose outside the kernel.
    return out_t.T


def init_linear(key, fan_in, fan_out):
    """torch.nn.Linear default init: U(-1/sqrt(fan_in), 1/sqrt(fan_in)), torch layout."""
    kw, kb = jax.random.split(key)
    bound = 1.0 / float(fan_in) ** 0.5
    w = jax.random.uniform(kw, (fan_out, fan_in), jnp.float32, -bound, bound)
    b = jax.random.uniform(kb, (fan_out,), jnp.float32, -bound, bound)
    return w, b


def build_actor_params(key, state_dim, dims, action_dim):
    layer_dims = [state_dim, *dims, action_dim]
    keys = jax.random.split(key, len(layer_dims) - 1)
    return tuple(init_linear(k, i, o)
                 for k, i, o in zip(keys, layer_dims[:-1], layer_dims[1:]))


def mlp_tanh_ref(state, params):
    (w1, b1), (w2, b2), (w3, b3) = params
    h = jnp.maximum(state @ w1.T + b1, 0.0)
    h = jnp.maximum(h @ w2.T + b2, 0.0)
    return jnp.tanh(h @ w3.T + b3)


if __name__ == "__main__":
    # Shapes consistent with Actor_TD3(dims=[32, 32], state_dim=16, action_dim=8)
    batch = 4
    state_dim = 16
    dims = (32, 32)
    action_dim = 8

    key = jax.random.PRNGKey(0)
    k_params, k_state = jax.random.split(key)

    params = build_actor_params(k_params, state_dim, dims, action_dim)
    state = jax.random.normal(k_state, (batch, state_dim), dtype=jnp.float32)

    ref = mlp_tanh_ref(state, params)

    # --- f32 path (exact semantics of the PyTorch module) ---
    w_packed, meta = pack_actor_params(params, jnp.float32)
    action = jax.block_until_ready(actor_td3_forward(state, w_packed, meta))
    assert action.shape == (batch, action_dim)
    assert action.dtype == jnp.float32
    assert bool(jnp.all(jnp.abs(action) <= 1.0))
    assert bool(jnp.allclose(action, ref, atol=1e-5, rtol=1e-5))

    # --- bf16 weight/activation path (v6e/v7x MXU-friendly), f32 accumulate ---
    w_bf16, meta_bf = pack_actor_params(params, jnp.bfloat16)
    action_bf = jax.block_until_ready(actor_td3_forward(state, w_bf16, meta_bf))
    assert action_bf.shape == (batch, action_dim)
    assert bool(jnp.allclose(action_bf, ref, atol=5e-2, rtol=5e-2))

    # --- larger, non-aligned batch exercising the multi-tile grid + ragged tail ---
    big_state = jax.random.normal(jax.random.PRNGKey(1), (300, state_dim), jnp.float32)
    big_ref = mlp_tanh_ref(big_state, params)
    big_action = jax.block_until_ready(actor_td3_forward(big_state, w_packed, meta))
    assert big_action.shape == (300, action_dim)
    assert bool(jnp.allclose(big_action, big_ref, atol=1e-4, rtol=1e-4))

    print("KERNEL_OK")
</pallas_src>

<mosaic_0001>
module attributes {stable_mosaic.version = 11 : i64} {
  func.func @kernel(%arg0: i32, %arg1: memref<4x16xf32, #tpu.memory_space<vmem>>, %arg2: memref<72x33xf32, #tpu.memory_space<vmem>>, %arg3: memref<8x4xf32, #tpu.memory_space<vmem>>) attributes {dimension_semantics = [#tpu.dimension_semantics<parallel>], iteration_bounds = array<i64: 1>, scalar_prefetch = 0 : i64, scratch_operands = 0 : i64, tpu.core_type = #tpu.core_type<tc>, window_params = [{transform_indices = @transform_0, window_bounds = array<i64: 4, 16>}, {pipeline_mode = #tpu.pipeline_mode<synchronous>, transform_indices = @transform_1, window_bounds = array<i64: 72, 33>}, {transform_indices = @transform_2, window_bounds = array<i64: 8, 4>}]} {
    %c0 = arith.constant 0 : index
    %c0_0 = arith.constant 0 : index
    %0 = vector.load %arg1[%c0, %c0_0] : memref<4x16xf32, #tpu.memory_space<vmem>>, vector<4x16xf32>
    %1 = tpu.transpose %0, [1, 0] : vector<4x16xf32> -> vector<16x4xf32>
    %c0_1 = arith.constant 0 : index
    %c0_2 = arith.constant 0 : index
    %2 = vector.load %arg2[%c0_1, %c0_2] : memref<72x33xf32, #tpu.memory_space<vmem>>, vector<32x16xf32>
    %c0_3 = arith.constant 0 : index
    %c16 = arith.constant 16 : index
    %3 = vector.load %arg2[%c0_3, %c16] : memref<72x33xf32, #tpu.memory_space<vmem>>, vector<32x1xf32>
    %c32 = arith.constant 32 : index
    %c0_4 = arith.constant 0 : index
    %4 = vector.load %arg2[%c32, %c0_4] : memref<72x33xf32, #tpu.memory_space<vmem>>, vector<32x32xf32>
    %c32_5 = arith.constant 32 : index
    %c32_6 = arith.constant 32 : index
    %5 = vector.load %arg2[%c32_5, %c32_6] : memref<72x33xf32, #tpu.memory_space<vmem>>, vector<32x1xf32>
    %c64 = arith.constant 64 : index
    %c0_7 = arith.constant 0 : index
    %6 = vector.load %arg2[%c64, %c0_7] : memref<72x33xf32, #tpu.memory_space<vmem>>, vector<8x32xf32>
    %c64_8 = arith.constant 64 : index
    %c32_9 = arith.constant 32 : index
    %7 = vector.load %arg2[%c64_8, %c32_9] : memref<72x33xf32, #tpu.memory_space<vmem>>, vector<8x1xf32>
    %cst = arith.constant dense<0.000000e+00> : vector<32x4xf32>
    %8 = tpu.matmul %2, %1, %cst {dimension_numbers = #tpu.dot_dimension_numbers<[1], [0], [0], [1], [0, 0, 1, 1], [], []>} : vector<32x16xf32>, vector<16x4xf32>, vector<32x4xf32> -> vector<32x4xf32>
    %9 = vector.broadcast %3 : vector<32x1xf32> to vector<32x4xf32>
    %10 = arith.addf %8, %9 : vector<32x4xf32>
    %cst_10 = arith.constant 0.000000e+00 : f32
    %11 = vector.broadcast %cst_10 : f32 to vector<32x4xf32>
    %12 = arith.maximumf %10, %11 : vector<32x4xf32>
    %cst_11 = arith.constant dense<0.000000e+00> : vector<32x4xf32>
    %13 = tpu.matmul %4, %12, %cst_11 {dimension_numbers = #tpu.dot_dimension_numbers<[1], [0], [0], [1], [0, 0, 1, 1], [], []>} : vector<32x32xf32>, vector<32x4xf32>, vector<32x4xf32> -> vector<32x4xf32>
    %14 = vector.broadcast %5 : vector<32x1xf32> to vector<32x4xf32>
    %15 = arith.addf %13, %14 : vector<32x4xf32>
    %cst_12 = arith.constant 0.000000e+00 : f32
    %16 = vector.broadcast %cst_12 : f32 to vector<32x4xf32>
    %17 = arith.maximumf %15, %16 : vector<32x4xf32>
    %cst_13 = arith.constant dense<0.000000e+00> : vector<8x4xf32>
    %18 = tpu.matmul %6, %17, %cst_13 {dimension_numbers = #tpu.dot_dimension_numbers<[1], [0], [0], [1], [0, 0, 1, 1], [], []>} : vector<8x32xf32>, vector<32x4xf32>, vector<8x4xf32> -> vector<8x4xf32>
    %19 = vector.broadcast %7 : vector<8x1xf32> to vector<8x4xf32>
    %20 = arith.addf %18, %19 : vector<8x4xf32>
    %21 = math.tanh %20 : vector<8x4xf32>
    %c0_14 = arith.constant 0 : index
    %c0_15 = arith.constant 0 : index
    %22 = vector.load %arg3[%c0_14, %c0_15] : memref<8x4xf32, #tpu.memory_space<vmem>>, vector<8x4xf32>
    tpu.vector_store %arg3[%c0_14, %c0_15], %21 {strides = array<i32>} : memref<8x4xf32, #tpu.memory_space<vmem>>, vector<8x4xf32>,
    return
  }
  func.func @transform_0(%arg0: i32) -> (i32, i32) {
    %c0_i32 = arith.constant 0 : i32
    %c0_i32_0 = arith.constant 0 : i32
    return %arg0, %c0_i32 : i32, i32
  }
  func.func @transform_1(%arg0: i32) -> (i32, i32) {
    %c0_i32 = arith.constant 0 : i32
    %c0_i32_0 = arith.constant 0 : i32
    %c0_i32_1 = arith.constant 0 : i32
    return %c0_i32, %c0_i32_0 : i32, i32
  }
  func.func @transform_2(%arg0: i32) -> (i32, i32) {
    %c0_i32 = arith.constant 0 : i32
    %c0_i32_0 = arith.constant 0 : i32
    return %c0_i32, %arg0 : i32, i32
  }
}

</mosaic_0001>

<bundles_post_ra>
// kernel: tpu_custom_call.1
= control target key start
LH: loop header
LB: loop body
LE: loop exit
PB: predicated region body
PF: predicated region fallthrough
CT: control target
= control target key end

     0   :  { %vm41_vm0 = vcmask 130048   ;;  %v415_v2 = vmov 16   ;;  %vm162_vm1 = vcmask 261120   ;;  %v416_v9 = vmov 32   ;;  %s478_s0 = inlined_call_operand.vmem [shape: f32[4,16], index: 0, kind: input, shape index: {}]   ;;  %s479_s1 = inlined_call_operand.vmem [shape: f32[72,33], index: 1, kind: input, shape index: {}]   ;;  %s480_s2 = inlined_call_operand.vmem [shape: f32[8,4], index: 2, kind: output, shape index: {}]  }
   0x1   :  { %v11_v0 = vld [vmem:[%s478_s0] sm:$0xf]  ;;  %410 = vset.pattern.permute.xlu1 %v415_v2  ;;  %409 = vset.pattern.permute.xlu0 %v415_v2  ;;  %v15_v3 = vld [vmem:[%s479_s1 + $0x18] sm:$0xff]  ;;  %v13_v4 = vld [vmem:[%s479_s1 + $0x8] sm:$0xff]  ;;  %v417_v28 = vmov 0.0   ;;  %vm418_vm2 = vmmov 0  }
   0x2   :  { %v12_v1 = vld [vmem:[%s479_s1] sm:$0xff]  ;;  %372 = vmatprep.subr.msk.mxu0 %vm41_vm0, %v11_v0  ;;  %38 = vperm.xlu0 %409, %v15_v3   ;;  %v14_v5 = vld [vmem:[%s479_s1 + $0x10] sm:$0xff]  ;;  %v19_v8 = vld [vmem:[%s479_s1 + $0x38] sm:$0xff]  ;;  %vm338_vm3 = vcmask 31744  }
   0x3   :  { %374 = vmatprep.mubr.msk.f32.mxu0 %vm41_vm0, %v12_v1  ;;  %373 = vmatpush3.xpose.msk.msra.mxu0 %vm41_vm0, %v11_v0  ;;  %v16_v6 = vld [vmem:[%s479_s1 + $0x20] sm:$0xff]  ;;  %v18_v7 = vld [vmem:[%s479_s1 + $0x30] sm:$0xff]  ;;  %v17_v10 = vld [vmem:[%s479_s1 + $0x28] sm:$0xff] }
   0x4   :  { %28 = vperm.xlu1 %410, %v13_v4   ;;  %388 = vmatprep.mubr.msk.f32.mxu1 %vm162_vm1, %v16_v6  ;;  %v20_v11 = vld [vmem:[%s479_s1 + $0x40] sm:$0xff] }
   0x5   :  { %394 = vmatprep.subr.mxu0 %v417_v28 }
   0x6   :  { %375 = vmatmul.mubr.msk.f32.vlgmr.msra.gmra.mxu0 %vm41_vm0, %v13_v4  ;;  %33 = vperm.xlu0 %409, %v14_v5  }
   0x7   :  { %377 = vmatprep.mubr.msk.f32.mxu0 %vm41_vm0, %v14_v5 }
   0x8   :  { %23 = vperm.xlu1 %410, %v12_v1  }
   0xa   :  { %378 = vmatmul.mubr.msk.f32.gmra.mxu0 %vm41_vm0, %v15_v3  ;;  %411 = vset.pattern.permute.xlu0 %v416_v9 }
   0xb   :  { %159 = vperm.xlu0 %411, %v19_v8   ;;  %402 = vmatprep.mubr.msk.f32.mxu0 %vm418_vm2, %v417_v28 }
   0xc   :  { %412 = vset.pattern.permute.xlu1 %v416_v9 }
   0xd   :  { %154 = vperm.xlu1 %412, %v18_v7  }
   0xf   :  { %144 = vperm.xlu0 %411, %v16_v6  }
  0x11   :  { %149 = vperm.xlu1 %412, %v17_v10  }
  0x15   :  { %262 = vperm.xlu1 %412, %v20_v11  }
  0x7d   :  { %v39_v12 = vpop.permute.xlu0 %38 }
  0x7f   :  { %v29_v13 = vpop.permute.xlu1 %28 }
  0x81   :  { %v34_v17 = vpop.permute.xlu0 %33 }
  0x83   :  { %v24_v19 = vpop.permute.xlu1 %23 }
  0x86   :  { %v160_v30 = vpop.permute.xlu0 %159 }
  0x88   :  { %v155_v29 = vpop.permute.xlu1 %154 }
  0x8a   :  { %v145_v36 = vpop.permute.xlu0 %144 }
  0x8c   :  { %v150_v33 = vpop.permute.xlu1 %149 }
  0x90   :  { %v263_v45 = vpop.permute.xlu1 %262 }
  0xc6   :  { %v376_v14 = vpop.f32.mrf.mxu0 }
  0xc7   :  { %v125_v21 = vadd.f32 %v376_v14, %v29_v13 }
  0xc8   :  { %v119_v15 = vpop.f32.mrf.mxu0 }
  0xc9   :  { %v120_v24 = vadd.f32 %v119_v15, %v24_v19  ;;  %v139_v26 = vmax.f32 %v125_v21, 0.0 }
  0xca   :  { %v379_v16 = vpop.f32.mrf.mxu0 }
  0xcb   :  { %v135_v18 = vadd.f32 %v379_v16, %v39_v12  ;;  %v138_v27 = vmax.f32 %v120_v24, 0.0 }
  0xcc   :  { %v129_v20 = vpop.f32.mrf.mxu0 }
  0xcd   :  { %v141_v22 = vmax.f32 %v135_v18, 0.0  ;;  %v130_v23 = vadd.f32 %v129_v20, %v34_v17 }
  0xcf   :  { %v140_v25 = vmax.f32 %v130_v23, 0.0  ;;  %380 = vmatprep.subr.mxu1 %v141_v22 }
  0xd0   :  { %381 = vmatpush3.msra.mxu1 %v141_v22 }
  0xd1   :  { %382 = vmatprep.subr.mxu1 %v140_v25 }
  0xd2   :  { %383 = vmatpush3.msra.mxu1 %v140_v25 }
  0xd3   :  { %384 = vmatprep.subr.mxu1 %v139_v26 }
  0xd4   :  { %385 = vmatpush3.msra.mxu1 %v139_v26 }
  0xd5   :  { %386 = vmatprep.subr.mxu1 %v138_v27 }
  0xd6   :  { %387 = vmatpush3.msra.mxu1 %v138_v27 }
  0xd7   :  { %389 = vmatmul.mubr.msk.f32.vlgmr.msra.gmra.mxu1 %vm162_vm1, %v17_v10 }
  0xd8   :  { %391 = vmatprep.mubr.msk.f32.mxu1 %vm162_vm1, %v18_v7 }
  0xdb   :  { %392 = vmatmul.mubr.msk.f32.gmra.mxu1 %vm162_vm1, %v19_v8 }
 0x197   :  { %v390_v31 = vpop.f32.mrf.mxu1 }
 0x198   :  { %v243_v38 = vadd.f32 %v390_v31, %v150_v33 }
 0x199   :  { %v237_v32 = vpop.f32.mrf.mxu1 }
 0x19a   :  { %v238_v41 = vadd.f32 %v237_v32, %v145_v36  ;;  %v257_v43 = vmax.f32 %v243_v38, 0.0 }
 0x19b   :  { %v393_v34 = vpop.f32.mrf.mxu1 }
 0x19c   :  { %v253_v35 = vadd.f32 %v393_v34, %v160_v30  ;;  %v256_v44 = vmax.f32 %v238_v41, 0.0 }
 0x19d   :  { %v247_v37 = vpop.f32.mrf.mxu1 }
 0x19e   :  { %v259_v39 = vmax.f32 %v253_v35, 0.0  ;;  %v248_v40 = vadd.f32 %v247_v37, %v155_v29 }
 0x1a0   :  { %v258_v42 = vmax.f32 %v248_v40, 0.0  ;;  %395 = vmatpush3.msra.mxu0 %v259_v39 }
 0x1a1   :  { %396 = vmatprep.subr.mxu0 %v417_v28 }
 0x1a2   :  { %397 = vmatpush3.msra.mxu0 %v258_v42 }
 0x1a3   :  { %398 = vmatprep.subr.mxu0 %v417_v28 }
 0x1a4   :  { %399 = vmatpush3.msra.mxu0 %v257_v43 }
 0x1a5   :  { %400 = vmatprep.subr.mxu0 %v417_v28 }
 0x1a6   :  { %401 = vmatpush3.msra.mxu0 %v256_v44 }
 0x1a7   :  { %403 = vmatmul.mubr.msk.f32.vlgmr.msra.gmra.mxu0 %vm162_vm1, %v20_v11 }
 0x267   :  { %v333_v46 = vpop.f32.mrf.mxu0 }
 0x268   :  { %v334_v47 = vadd.f32 %v333_v46, %v263_v45 }
 0x269   :  { %v404_v48 = vpop.f32.mrf.mxu0 }
 0x26a   :  { %413 = vtanh.f32 %v334_v47 }
 0x277   :  { %v414_v49 = vpop.eup %413 }
 0x278   :  { %339 = vst.msk [vmem:[%s480_s2] sm:$0xff] %vm338_vm3, %v414_v49 }

</bundles_post_ra>
